<compile_context>
chip_gen: v7x
topology: tpu7x:2x2x1
jax: 0.10.0
libtpu: 0.0.40
codegen_flags: <defaults>
</compile_context>

<pallas_src>
import functools

import jax
import jax.numpy as jnp
from jax.experimental import pallas as pl
from jax.experimental.pallas import tpu as pltpu


def _round_up(x, m):
    return -(-x // m) * m


def _neumf_kernel(num_hidden_layers, compute_dtype, *refs):
    """Kernel body (one batch tile, feature-major layout).

    refs layout (inputs..., output):
      p_mf, q_mf, p_mlp, q_mlp            [F, TB]          compute_dtype
      w0_u, w0_v                          [H0, F]          compute_dtype
      b0                                  [H0, 1]          f32
      (w_i, b_i) for layers 1..L-1        [H_i, H_{i-1}], [H_i, 1]
      wpred_gmf                           [1, F]           compute_dtype
      wpred_mlp                           [1, H_last]      compute_dtype
      out                                 [1, TB]          f32
    """
    it = iter(refs)
    p_mf_ref = next(it)
    q_mf_ref = next(it)
    p_mlp_ref = next(it)
    q_mlp_ref = next(it)
    w0_u_ref = next(it)
    w0_v_ref = next(it)
    b0_ref = next(it)
    hidden = [(next(it), next(it)) for _ in range(num_hidden_layers - 1)]
    wpred_g_ref = next(it)
    wpred_m_ref = next(it)
    out_ref = next(it)

    f32 = jnp.float32

    # GMF branch: elementwise product on the VPU in f32 (v5e-safe).
    gmf = p_mf_ref[...].astype(f32) * q_mf_ref[...].astype(f32)

    # MLP branch. Layer 0: torch.cat((p_mlp, q_mlp)) is folded into two
    # split-weight matmuls -> no lane-axis concat / relayout inside the kernel.
    x = jnp.dot(w0_u_ref[...], p_mlp_ref[...], preferred_element_type=f32)
    x = x + jnp.dot(w0_v_ref[...], q_mlp_ref[...], preferred_element_type=f32)
    x = jnp.maximum(x + b0_ref[...], 0.0)            # bias + ReLU in f32
    for w_ref, b_ref in hidden:
        x = jnp.dot(w_ref[...], x.astype(compute_dtype),
                    preferred_element_type=f32)
        x = jnp.maximum(x + b_ref[...], 0.0)

    # Prediction layer: torch.cat((gmf, mlp)) folded into two dots.
    # Output block is [1, TB] -> lane-dense stores.
    out = jnp.dot(wpred_g_ref[...], gmf.astype(compute_dtype),
                  preferred_element_type=f32)
    out = out + jnp.dot(wpred_m_ref[...], x.astype(compute_dtype),
                        preferred_element_type=f32)
    out_ref[...] = out


def neumf_forward(params, user_id, item_id, *,
                  compute_dtype=jnp.bfloat16, batch_tile=None):
    """NeuMF forward: JAX-side embedding gathers + Pallas kernel for the math.

    Returns [batch, 1] f32 scores, matching the PyTorch module's forward.
    """
    num_factors = params["P"].shape[1]
    mlp_params = params["mlp"]                  # list of (W [in,out], b [1,out])
    num_layers = len(mlp_params)
    h_last = mlp_params[-1][0].shape[1]
    batch = user_id.shape[0]

    # Batch tile: lane-dense (multiple of 128); big enough to amortize the
    # ~0.35us per-grid-step overhead, small enough that double-buffered
    # activations stay far inside v7x's 64 MiB VMEM.
    if batch_tile is None:
        batch_tile = 128 if batch <= 128 else min(2048, _round_up(batch, 128))
    padded = _round_up(batch, batch_tile)
    if padded != batch:
        pad = padded - batch
        user_id = jnp.concatenate(
            [user_id, jnp.zeros((pad,), dtype=user_id.dtype)])
        item_id = jnp.concatenate(
            [item_id, jnp.zeros((pad,), dtype=item_id.dtype)])

    cd = compute_dtype

    # Embedding gathers (glue, stays in JAX), transposed to feature-major so
    # the kernel sees batch on the lane axis.
    p_mf = jnp.take(params["P"], user_id, axis=0).astype(cd).T    # [F, Bp]
    q_mf = jnp.take(params["Q"], item_id, axis=0).astype(cd).T
    p_mlp = jnp.take(params["U"], user_id, axis=0).astype(cd).T
    q_mlp = jnp.take(params["V"], item_id, axis=0).astype(cd).T

    # Weight prep: transposed and split so the kernel never concatenates.
    w0, b0 = mlp_params[0]
    weight_ops = [
        w0[:num_factors, :].T.astype(cd),       # W0_u  [H0, F]
        w0[num_factors:, :].T.astype(cd),       # W0_v  [H0, F]
        b0.T.astype(jnp.float32),               # b0    [H0, 1]
    ]
    for w, b in mlp_params[1:]:
        weight_ops += [w.T.astype(cd), b.T.astype(jnp.float32)]
    w_pred = params["w_pred"]                   # [F + H_last, 1]; rows 0:F = gmf
    weight_ops += [
        w_pred[:num_factors, :].T.astype(cd),   # [1, F]
        w_pred[num_factors:, :].T.astype(cd),   # [1, H_last]
    ]

    operands = [p_mf, q_mf, p_mlp, q_mlp] + weight_ops

    grid = (padded // batch_tile,)
    act_spec = pl.BlockSpec((num_factors, batch_tile), lambda i: (0, i))
    in_specs = [act_spec] * 4 + [
        pl.BlockSpec(tuple(w.shape), lambda i: (0, 0)) for w in weight_ops
    ]
    out_spec = pl.BlockSpec((1, batch_tile), lambda i: (0, i))

    # Advisory cost estimate so XLA schedules the gathers/casts sensibly.
    h0 = mlp_params[0][0].shape[1]
    flops_row = 4 * num_factors * h0            # split first layer
    prev = h0
    for w, _ in mlp_params[1:]:
        flops_row += 2 * prev * w.shape[1]
        prev = w.shape[1]
    flops_row += 2 * (num_factors + h_last) + num_factors   # prediction + gmf
    bytes_accessed = sum(int(a.size) * a.dtype.itemsize for a in operands)
    bytes_accessed += padded * 4                              # f32 output
    cost = pl.CostEstimate(flops=int(flops_row * padded), transcendentals=0,
                           bytes_accessed=int(bytes_accessed))

    out = pl.pallas_call(
        functools.partial(_neumf_kernel, num_layers, cd),
        out_shape=jax.ShapeDtypeStruct((1, padded), jnp.float32),
        grid_spec=pltpu.PrefetchScalarGridSpec(
            num_scalar_prefetch=0,
            grid=grid,
            in_specs=in_specs,
            out_specs=out_spec,
        ),
        compiler_params=pltpu.CompilerParams(
            dimension_semantics=("parallel",),   # v7x: shard tiles across TCs
            vmem_limit_bytes=32 * 1024 * 1024,
        ),
        cost_estimate=cost,
    )(*operands)

    return out[0, :batch][:, None]               # [batch, 1], matches module


def init_params(key, num_factors, num_users, num_items, num_hiddens):
    """Deterministic parameter init mirroring the module's shapes.

    PyTorch nn.Linear stores weight as [out, in]; we store the transposed
    [in, out] so the math is x @ W (same semantics).
    """
    keys = jax.random.split(key, 6 + 2 * len(num_hiddens))
    k = iter(keys)
    params = {}
    params["P"] = jax.random.normal(next(k), (num_users + 1, num_factors), jnp.float32)
    params["Q"] = jax.random.normal(next(k), (num_items + 1, num_factors), jnp.float32)
    params["U"] = jax.random.normal(next(k), (num_users + 1, num_factors), jnp.float32)
    params["V"] = jax.random.normal(next(k), (num_items + 1, num_factors), jnp.float32)

    mlp = []
    in_dim = num_factors * 2
    for h in num_hiddens:
        w = 0.01 * jax.random.normal(next(k), (in_dim, h), jnp.float32)
        b = 0.01 * jax.random.normal(next(k), (1, h), jnp.float32)
        mlp.append((w, b))
        in_dim = h
    params["mlp"] = mlp

    # Prediction layer: Linear(num_hiddens[-1] + num_factors, 1, bias=False)
    params["w_pred"] = 0.01 * jax.random.normal(
        next(k), (num_factors + num_hiddens[-1], 1), jnp.float32)
    return params


def neumf_reference(params, user_id, item_id):
    """Pure-JAX reference for correctness checking (highest matmul precision)."""
    hi = jax.lax.Precision.HIGHEST
    p_mf = jnp.take(params["P"], user_id, axis=0)
    q_mf = jnp.take(params["Q"], item_id, axis=0)
    gmf = p_mf * q_mf
    x = jnp.concatenate(
        [jnp.take(params["U"], user_id, axis=0),
         jnp.take(params["V"], item_id, axis=0)], axis=1)
    for w, b in params["mlp"]:
        x = jnp.maximum(jnp.dot(x, w, precision=hi) + b, 0.0)
    con = jnp.concatenate([gmf, x], axis=1)
    return jnp.dot(con, params["w_pred"], precision=hi)


if __name__ == "__main__":
    # Small, module-consistent shapes.
    num_factors = 16
    num_users = 20
    num_items = 30
    num_hiddens = [32, 16]
    batch = 8

    key = jax.random.PRNGKey(0)
    pkey, ukey, ikey = jax.random.split(key, 3)
    params = init_params(pkey, num_factors, num_users, num_items, num_hiddens)

    user_id = jax.random.randint(ukey, (batch,), 0, num_users + 1, jnp.int32)
    item_id = jax.random.randint(ikey, (batch,), 0, num_items + 1, jnp.int32)

    ref = neumf_reference(params, user_id, item_id)

    # Exact-ish f32 path.
    out_f32 = jax.block_until_ready(
        neumf_forward(params, user_id, item_id, compute_dtype=jnp.float32))
    assert out_f32.shape == (batch, 1), out_f32.shape
    assert jnp.allclose(out_f32, ref, atol=1e-3, rtol=1e-3), (out_f32, ref)

    # Default fast path: bf16 matmul operands, f32 accumulation.
    out_bf16 = jax.block_until_ready(neumf_forward(params, user_id, item_id))
    assert out_bf16.shape == (batch, 1), out_bf16.shape
    assert jnp.allclose(out_bf16, ref, atol=1e-2, rtol=5e-2), (out_bf16, ref)

    print("KERNEL_OK")
</pallas_src>

<mosaic_0001>
module attributes {stable_mosaic.version = 11 : i64} {
  func.func @_neumf_kernel(%arg0: i32, %arg1: memref<16x128xf32, #tpu.memory_space<vmem>>, %arg2: memref<16x128xf32, #tpu.memory_space<vmem>>, %arg3: memref<16x128xf32, #tpu.memory_space<vmem>>, %arg4: memref<16x128xf32, #tpu.memory_space<vmem>>, %arg5: memref<32x16xf32, #tpu.memory_space<vmem>>, %arg6: memref<32x16xf32, #tpu.memory_space<vmem>>, %arg7: memref<32x1xf32, #tpu.memory_space<vmem>>, %arg8: memref<16x32xf32, #tpu.memory_space<vmem>>, %arg9: memref<16x1xf32, #tpu.memory_space<vmem>>, %arg10: memref<1x16xf32, #tpu.memory_space<vmem>>, %arg11: memref<1x16xf32, #tpu.memory_space<vmem>>, %arg12: memref<1x128xf32, #tpu.memory_space<vmem>>) attributes {dimension_semantics = [#tpu.dimension_semantics<parallel>], iteration_bounds = array<i64: 1>, scalar_prefetch = 0 : i64, scratch_operands = 0 : i64, tpu.core_type = #tpu.core_type<tc>, window_params = [{transform_indices = @transform_0, window_bounds = array<i64: 16, 128>}, {transform_indices = @transform_1, window_bounds = array<i64: 16, 128>}, {transform_indices = @transform_2, window_bounds = array<i64: 16, 128>}, {transform_indices = @transform_3, window_bounds = array<i64: 16, 128>}, {pipeline_mode = #tpu.pipeline_mode<synchronous>, transform_indices = @transform_4, window_bounds = array<i64: 32, 16>}, {pipeline_mode = #tpu.pipeline_mode<synchronous>, transform_indices = @transform_5, window_bounds = array<i64: 32, 16>}, {pipeline_mode = #tpu.pipeline_mode<synchronous>, transform_indices = @transform_6, window_bounds = array<i64: 32, 1>}, {pipeline_mode = #tpu.pipeline_mode<synchronous>, transform_indices = @transform_7, window_bounds = array<i64: 16, 32>}, {pipeline_mode = #tpu.pipeline_mode<synchronous>, transform_indices = @transform_8, window_bounds = array<i64: 16, 1>}, {pipeline_mode = #tpu.pipeline_mode<synchronous>, transform_indices = @transform_9, window_bounds = array<i64: 1, 16>}, {pipeline_mode = #tpu.pipeline_mode<synchronous>, transform_indices = @transform_10, window_bounds = array<i64: 1, 16>}, {transform_indices = @transform_11, window_bounds = array<i64: 1, 128>}]} {
    %c0 = arith.constant 0 : index
    %c0_0 = arith.constant 0 : index
    %0 = vector.load %arg1[%c0, %c0_0] : memref<16x128xf32, #tpu.memory_space<vmem>>, vector<16x128xf32>
    %c0_1 = arith.constant 0 : index
    %c0_2 = arith.constant 0 : index
    %1 = vector.load %arg2[%c0_1, %c0_2] : memref<16x128xf32, #tpu.memory_space<vmem>>, vector<16x128xf32>
    %2 = arith.mulf %0, %1 : vector<16x128xf32>
    %c0_3 = arith.constant 0 : index
    %c0_4 = arith.constant 0 : index
    %3 = vector.load %arg5[%c0_3, %c0_4] : memref<32x16xf32, #tpu.memory_space<vmem>>, vector<32x16xf32>
    %c0_5 = arith.constant 0 : index
    %c0_6 = arith.constant 0 : index
    %4 = vector.load %arg3[%c0_5, %c0_6] : memref<16x128xf32, #tpu.memory_space<vmem>>, vector<16x128xf32>
    %cst = arith.constant dense<0.000000e+00> : vector<32x128xf32>
    %5 = tpu.matmul %3, %4, %cst {dimension_numbers = #tpu.dot_dimension_numbers<[1], [0], [0], [1], [0, 0, 1, 1], [], []>} : vector<32x16xf32>, vector<16x128xf32>, vector<32x128xf32> -> vector<32x128xf32>
    %c0_7 = arith.constant 0 : index
    %c0_8 = arith.constant 0 : index
    %6 = vector.load %arg6[%c0_7, %c0_8] : memref<32x16xf32, #tpu.memory_space<vmem>>, vector<32x16xf32>
    %c0_9 = arith.constant 0 : index
    %c0_10 = arith.constant 0 : index
    %7 = vector.load %arg4[%c0_9, %c0_10] : memref<16x128xf32, #tpu.memory_space<vmem>>, vector<16x128xf32>
    %cst_11 = arith.constant dense<0.000000e+00> : vector<32x128xf32>
    %8 = tpu.matmul %6, %7, %cst_11 {dimension_numbers = #tpu.dot_dimension_numbers<[1], [0], [0], [1], [0, 0, 1, 1], [], []>} : vector<32x16xf32>, vector<16x128xf32>, vector<32x128xf32> -> vector<32x128xf32>
    %9 = arith.addf %5, %8 : vector<32x128xf32>
    %c0_12 = arith.constant 0 : index
    %c0_13 = arith.constant 0 : index
    %10 = vector.load %arg7[%c0_12, %c0_13] : memref<32x1xf32, #tpu.memory_space<vmem>>, vector<32x1xf32>
    %11 = vector.broadcast %10 : vector<32x1xf32> to vector<32x128xf32>
    %12 = arith.addf %9, %11 : vector<32x128xf32>
    %cst_14 = arith.constant 0.000000e+00 : f32
    %13 = vector.broadcast %cst_14 : f32 to vector<32x128xf32>
    %14 = arith.maximumf %12, %13 : vector<32x128xf32>
    %c0_15 = arith.constant 0 : index
    %c0_16 = arith.constant 0 : index
    %15 = vector.load %arg8[%c0_15, %c0_16] : memref<16x32xf32, #tpu.memory_space<vmem>>, vector<16x32xf32>
    %cst_17 = arith.constant dense<0.000000e+00> : vector<16x128xf32>
    %16 = tpu.matmul %15, %14, %cst_17 {dimension_numbers = #tpu.dot_dimension_numbers<[1], [0], [0], [1], [0, 0, 1, 1], [], []>} : vector<16x32xf32>, vector<32x128xf32>, vector<16x128xf32> -> vector<16x128xf32>
    %c0_18 = arith.constant 0 : index
    %c0_19 = arith.constant 0 : index
    %17 = vector.load %arg9[%c0_18, %c0_19] : memref<16x1xf32, #tpu.memory_space<vmem>>, vector<16x1xf32>
    %18 = vector.broadcast %17 : vector<16x1xf32> to vector<16x128xf32>
    %19 = arith.addf %16, %18 : vector<16x128xf32>
    %cst_20 = arith.constant 0.000000e+00 : f32
    %20 = vector.broadcast %cst_20 : f32 to vector<16x128xf32>
    %21 = arith.maximumf %19, %20 : vector<16x128xf32>
    %c0_21 = arith.constant 0 : index
    %c0_22 = arith.constant 0 : index
    %22 = vector.load %arg10[%c0_21, %c0_22] : memref<1x16xf32, #tpu.memory_space<vmem>>, vector<1x16xf32>
    %cst_23 = arith.constant dense<0.000000e+00> : vector<1x128xf32>
    %23 = tpu.matmul %22, %2, %cst_23 {dimension_numbers = #tpu.dot_dimension_numbers<[1], [0], [0], [1], [0, 0, 1, 1], [], []>} : vector<1x16xf32>, vector<16x128xf32>, vector<1x128xf32> -> vector<1x128xf32>
    %c0_24 = arith.constant 0 : index
    %c0_25 = arith.constant 0 : index
    %24 = vector.load %arg11[%c0_24, %c0_25] : memref<1x16xf32, #tpu.memory_space<vmem>>, vector<1x16xf32>
    %cst_26 = arith.constant dense<0.000000e+00> : vector<1x128xf32>
    %25 = tpu.matmul %24, %21, %cst_26 {dimension_numbers = #tpu.dot_dimension_numbers<[1], [0], [0], [1], [0, 0, 1, 1], [], []>} : vector<1x16xf32>, vector<16x128xf32>, vector<1x128xf32> -> vector<1x128xf32>
    %26 = arith.addf %23, %25 : vector<1x128xf32>
    %c0_27 = arith.constant 0 : index
    %c0_28 = arith.constant 0 : index
    %27 = vector.load %arg12[%c0_27, %c0_28] : memref<1x128xf32, #tpu.memory_space<vmem>>, vector<1x128xf32>
    tpu.vector_store %arg12[%c0_27, %c0_28], %26 {strides = array<i32>} : memref<1x128xf32, #tpu.memory_space<vmem>>, vector<1x128xf32>,
    return
  }
  func.func @transform_0(%arg0: i32) -> (i32, i32) {
    %c0_i32 = arith.constant 0 : i32
    %c0_i32_0 = arith.constant 0 : i32
    return %c0_i32, %arg0 : i32, i32
  }
  func.func @transform_1(%arg0: i32) -> (i32, i32) {
    %c0_i32 = arith.constant 0 : i32
    %c0_i32_0 = arith.constant 0 : i32
    return %c0_i32, %arg0 : i32, i32
  }
  func.func @transform_2(%arg0: i32) -> (i32, i32) {
    %c0_i32 = arith.constant 0 : i32
    %c0_i32_0 = arith.constant 0 : i32
    return %c0_i32, %arg0 : i32, i32
  }
  func.func @transform_3(%arg0: i32) -> (i32, i32) {
    %c0_i32 = arith.constant 0 : i32
    %c0_i32_0 = arith.constant 0 : i32
    return %c0_i32, %arg0 : i32, i32
  }
  func.func @transform_4(%arg0: i32) -> (i32, i32) {
    %c0_i32 = arith.constant 0 : i32
    %c0_i32_0 = arith.constant 0 : i32
    %c0_i32_1 = arith.constant 0 : i32
    return %c0_i32, %c0_i32_0 : i32, i32
  }
  func.func @transform_5(%arg0: i32) -> (i32, i32) {
    %c0_i32 = arith.constant 0 : i32
    %c0_i32_0 = arith.constant 0 : i32
    %c0_i32_1 = arith.constant 0 : i32
    return %c0_i32, %c0_i32_0 : i32, i32
  }
  func.func @transform_6(%arg0: i32) -> (i32, i32) {
    %c0_i32 = arith.constant 0 : i32
    %c0_i32_0 = arith.constant 0 : i32
    %c0_i32_1 = arith.constant 0 : i32
    return %c0_i32, %c0_i32_0 : i32, i32
  }
  func.func @transform_7(%arg0: i32) -> (i32, i32) {
    %c0_i32 = arith.constant 0 : i32
    %c0_i32_0 = arith.constant 0 : i32
    %c0_i32_1 = arith.constant 0 : i32
    return %c0_i32, %c0_i32_0 : i32, i32
  }
  func.func @transform_8(%arg0: i32) -> (i32, i32) {
    %c0_i32 = arith.constant 0 : i32
    %c0_i32_0 = arith.constant 0 : i32
    %c0_i32_1 = arith.constant 0 : i32
    return %c0_i32, %c0_i32_0 : i32, i32
  }
  func.func @transform_9(%arg0: i32) -> (i32, i32) {
    %c0_i32 = arith.constant 0 : i32
    %c0_i32_0 = arith.constant 0 : i32
    %c0_i32_1 = arith.constant 0 : i32
    return %c0_i32, %c0_i32_0 : i32, i32
  }
  func.func @transform_10(%arg0: i32) -> (i32, i32) {
    %c0_i32 = arith.constant 0 : i32
    %c0_i32_0 = arith.constant 0 : i32
    %c0_i32_1 = arith.constant 0 : i32
    return %c0_i32, %c0_i32_0 : i32, i32
  }
  func.func @transform_11(%arg0: i32) -> (i32, i32) {
    %c0_i32 = arith.constant 0 : i32
    %c0_i32_0 = arith.constant 0 : i32
    return %c0_i32, %arg0 : i32, i32
  }
}

</mosaic_0001>

<bundles_post_ra>
// kernel: tpu_custom_call.1
= control target key start
LH: loop header
LB: loop body
LE: loop exit
PB: predicated region body
PF: predicated region fallthrough
CT: control target
= control target key end

     0   :  { %vm57_vm0 = vcmask 130048   ;;  %v685_v6 = vmov 0   ;;  %s854_s0 = inlined_call_operand.vmem [shape: f32[16,128], index: 0, kind: input, shape index: {}]   ;;  %s855_s1 = inlined_call_operand.vmem [shape: f32[16,128], index: 1, kind: input, shape index: {}]   ;;  %s856_s2 = inlined_call_operand.vmem [shape: f32[16,128], index: 2, kind: input, shape index: {}]   ;;  %s857_s3 = inlined_call_operand.vmem [shape: f32[16,128], index: 3, kind: input, shape index: {}]   ;;  %s858_s4 = inlined_call_operand.vmem [shape: f32[32,16], index: 4, kind: input, shape index: {}]   ;;  %s859_s5 = inlined_call_operand.vmem [shape: f32[32,16], index: 5, kind: input, shape index: {}]   ;;  %s860_s6 = inlined_call_operand.vmem [shape: f32[32,1], index: 6, kind: input, shape index: {}]   ;;  %s861_s7 = inlined_call_operand.vmem [shape: f32[16,32], index: 7, kind: input, shape index: {}]   ;;  %s862_s8 = inlined_call_operand.vmem [shape: f32[16,1], index: 8, kind: input, shape index: {}]   ;;  %s863_s9 = inlined_call_operand.vmem [shape: f32[1,16], index: 9, kind: input, shape index: {}]   ;;  %s864_s10 = inlined_call_operand.vmem [shape: f32[1,16], index: 10, kind: input, shape index: {}]   ;;  %s865_s11 = inlined_call_operand.hbm [shape: f32[1,128], index: 11, kind: output, shape index: {}]  }
   0x1   :  { %v55_v0 = vld [vmem:[%s857_s3] sm:$0xff]  ;;  %v56_v1 = vld [vmem:[%s857_s3 + $0x8] sm:$0xff]  ;;  %659 = vset.pattern.permute.xlu0 %v685_v6  ;;  %660 = vset.pattern.permute.xlu1 %v685_v6  ;;  %v254_v10 = vld [vmem:[%s860_s6 + $0x10] sm:$0xff] }
   0x2   :  { %v51_v2 = vld [vmem:[%s859_s5] sm:$0xff]  ;;  %v626_v3 = vpack.c.bf16 %v56_v1, %v55_v0  ;;  %v50_v5 = vld [vmem:[%s856_s2 + $0x8] sm:$0xff]  ;;  %v53_v11 = vld [vmem:[%s859_s5 + $0x10] sm:$0xff]  ;;  %268 = vperm.xlu1 %660, %v254_v10  }
   0x3   :  { %585 = vmatprep.mubr.msk.f32.mxu0 %vm57_vm0, %v51_v2  ;;  %v49_v4 = vld [vmem:[%s856_s2] sm:$0xff]  ;;  %v52_v8 = vld [vmem:[%s859_s5 + $0x8] sm:$0xff] }
   0x4   :  { %v630_v7 = vpack.c.bf16 %v50_v5, %v49_v4  ;;  %627 = vmatprep.subr.bf16.mxu0 %v626_v3  ;;  %v252_v9 = vld [vmem:[%s860_s6] sm:$0xff]  ;;  %v253_v12 = vld [vmem:[%s860_s6 + $0x8] sm:$0xff] }
   0x5   :  { %629 = vmatpush3.bf16.msra.mxu0 %v626_v3  ;;  %258 = vperm.xlu0 %659, %v252_v9  }
   0x6   :  { %631 = vmatprep.subr.bf16.mxu0 %v630_v7 }
   0x7   :  { %16 = vsyncpa [#allocation3], 0  ;;  %v255_v13 = vld [vmem:[%s860_s6 + $0x18] sm:$0xff]  ;;  %v45_v15 = vld [vmem:[%s858_s4] sm:$0xff]  ;;  %vm298_vm1 = vcmask 261120   ;;  %v686_v41 = vmov 0.0|0.0  }
   0x8   :  { %586 = vmatmul.mubr.msk.f32.vlgmr.msra.gmra.mrb[0].mxu0 %vm57_vm0, %v52_v8  ;;  %v54_v14 = vld [vmem:[%s859_s5 + $0x18] sm:$0xff]  ;;  %273 = vperm.xlu1 %660, %v255_v13   ;;  %v286_v16 = vld [vmem:[%s862_s8] sm:$0xff]  ;;  %v287_v17 = vld [vmem:[%s862_s8 + $0x8] sm:$0xff]  ;;  %vm687_vm2 = vmmov 0   ;;  %v688_v42 = vmov 0.0   ;;  %s689_s20 = smov [#allocation2]  }
   0x9   :  { %633 = vmatpush3.bf16.msra.mxu0 %v630_v7  ;;  %588 = vmatprep.mubr.msk.f32.mxu0 %vm57_vm0, %v53_v11  ;;  %v46_v18 = vld [vmem:[%s858_s4 + $0x8] sm:$0xff]  ;;  %v47_v19 = vld [vmem:[%s858_s4 + $0x10] sm:$0xff]  ;;  %v48_v20 = vld [vmem:[%s858_s4 + $0x18] sm:$0xff]  ;;  %s537_s21 = sshll.u32 %s689_s20, 4  ;;  %s538_s21 = int_to_ptr.vmem [resolvable:$true] %s537_s21 }
   0xa   :  { %263 = vperm.xlu0 %659, %v253_v12   ;;  %v284_v21 = vld [vmem:[%s861_s7] sm:$0xff]  ;;  %v285_v40 = vld [vmem:[%s861_s7 + $0x8] sm:$0xff]  ;;  %s665_s22 = scalar_lea.vmem %s538_s21, 32  ;;  %p666_p1 = scmp.lt.s32.totalorder %s538_s21, %s538_s21 }
   0xb   :  { %609 = vmatprep.mubr.msk.f32.mxu1 %vm298_vm1, %v284_v21  ;;  %v39_v45 = vld [vmem:[%s854_s0] sm:$0xff]  ;;  %v40_v49 = vld [vmem:[%s854_s0 + $0x8] sm:$0xff] }
   0xc   :  { %589 = vmatmul.mubr.msk.f32.gmra.mrb[2].mxu0 %vm57_vm0, %v54_v14  ;;  %295 = vperm.xlu1 %660, %v287_v17   ;;  %v41_v50 = vld [vmem:[%s855_s1] sm:$0xff]  ;;  %v42_v51 = vld [vmem:[%s855_s1 + $0x8] sm:$0xff] }
   0xd   :  { %595 = vmatprep.mubr.msk.f32.mxu0 %vm57_vm0, %v45_v15  ;;  %v43_v55 = vmul.f32 %v41_v50, %v39_v45  ;;  %v44_v56 = vmul.f32 %v42_v51, %v40_v49  ;;  %v383_v58 = vld [vmem:[%s864_s10] sm:$0x1]  ;;  %s661_s10 = scalar_lea.vmem %s538_s21, 16 }
   0xe   :  { %290 = vperm.xlu0 %659, %v286_v16   ;;  %v382_v60 = vld [vmem:[%s863_s9] sm:$0x1]  ;;  %p662_p0 = scmp.ne.s32.totalorder %s538_s21, %s661_s10  ;;  %p667_p2 = scmp.lt.s32.totalorder %s665_s22, %s661_s10 }
   0xf   :  { %v646_v59 = vpack.c.bf16 %v44_v56, %v43_v55 }
  0x10   :  { %596 = vmatmul.mubr.msk.f32.vlgmr.msra.gmra.mrb[0].mxu0 %vm57_vm0, %v46_v18  ;;  %p668_p3 = por %p667_p2, %p666_p1 }
  0x11   :  { %598 = vmatprep.mubr.msk.f32.mxu0 %vm57_vm0, %v47_v19 }
  0x12   :  { %p669_p4 = pnand %p668_p3, %p662_p0 }
  0x14   :  { %599 = vmatmul.mubr.msk.f32.gmra.mrb[2].mxu0 %vm57_vm0, %v48_v20 }
  0x81   :  { %v269_v23 = vpop.permute.xlu1 %268 }
  0x84   :  { %v259_v22 = vpop.permute.xlu0 %258 }
  0x87   :  { %v274_v30 = vpop.permute.xlu1 %273 }
  0x89   :  { %v264_v24 = vpop.permute.xlu0 %263 }
  0x8b   :  { %v296_v43 = vpop.permute.xlu1 %295 }
  0x8d   :  { %v291_v46 = vpop.permute.xlu0 %290 }
  0xe3   :  { %v597_v25 = vpop.f32.mrb[0].mxu0 }
  0xe4   :  { %v277_v26 = vadd.f32 %v597_v25, %v264_v24  ;;  %v233_v27 = vpop.f32.mrb[1].mxu0 }
  0xe5   :  { %v276_v28 = vadd.f32 %v259_v22, %v233_v27 }
  0xe6   :  { %v281_v29 = vmax.f32 %v277_v26, 0.0 }
  0xe7   :  { %v280_v31 = vmax.f32 %v276_v28, 0.0  ;;  %v600_v32 = vpop.f32.mrb[2].mxu0 }
  0xe8   :  { %v279_v33 = vadd.f32 %v600_v32, %v274_v30  ;;  %v243_v34 = vpop.f32.mrb[3].mxu0 }
  0xe9   :  { %v278_v35 = vadd.f32 %v269_v23, %v243_v34  ;;  %v634_v36 = vpack.c.bf16 %v281_v29, %v280_v31 }
  0xea   :  { %v283_v37 = vmax.f32 %v279_v33, 0.0 }
  0xeb   :  { %v282_v38 = vmax.f32 %v278_v35, 0.0  ;;  %635 = vmatprep.subr.bf16.mxu1 %v634_v36 }
  0xec   :  { %637 = vmatpush3.bf16.msra.mxu1 %v634_v36 }
  0xed   :  { %v638_v39 = vpack.c.bf16 %v283_v37, %v282_v38 }
  0xef   :  { %639 = vmatprep.subr.bf16.mxu1 %v638_v39 }
  0xf0   :  { %641 = vmatpush3.bf16.msra.mxu1 %v638_v39 }
  0xf1   :  { %642 = vmatprep.subr.bf16.mxu1 %v686_v41 }
  0xf3   :  { %610 = vmatmul.mubr.msk.f32.vlgmr.msra.gmra.mrb[0].mxu1 %vm298_vm1, %v285_v40 }
  0xf4   :  { %616 = vmatprep.mubr.msk.f32.mxu1 %vm687_vm2, %v688_v42 }
 0x1c6   :  { %v611_v44 = vpop.f32.mrb[0].mxu1 }
 0x1c7   :  { %v377_v47 = vadd.f32 %v611_v44, %v296_v43  ;;  %v371_v48 = vpop.f32.mrb[1].mxu1 }
 0x1c8   :  { %v372_v52 = vadd.f32 %v371_v48, %v291_v46 }
 0x1c9   :  { %v381_v53 = vmax.f32 %v377_v47, 0.0 }
 0x1ca   :  { %v380_v54 = vmax.f32 %v372_v52, 0.0 }
 0x1cc   :  { %v643_v57 = vpack.c.bf16 %v381_v53, %v380_v54 }
 0x1ce   :  { %644 = vmatpush3.bf16.msra.mxu1 %v643_v57 }
 0x1cf   :  { %645 = vmatprep.subr.bf16.mxu1 %v686_v41 }
 0x1d1   :  { %617 = vmatmul.mubr.msk.f32.vlgmr.msra.gmra.mrb[2].mxu1 %vm57_vm0, %v383_v58 }
 0x1d2   :  { %647 = vmatpush3.bf16.msra.mxu1 %v646_v59  ;;  %623 = vmatprep.mubr.msk.f32.mxu1 %vm687_vm2, %v688_v42 }
 0x1d9   :  { %624 = vmatmul.mubr.msk.f32.vlgmr.msra.gmra.mrb[2].mxu1 %vm57_vm0, %v382_v60 }
 0x2ac   :  { %v526_v61 = vpop.f32.mrb[2].mxu1 }
 0x2ad   :  { %530 = vst [vmem:[#allocation2] sm:$0x1] %v526_v61  ;;  %v625_v62 = vpop.f32.mrb[3].mxu1 }
 0x2ae   :  { %672 = shalt.err (!%p669_p4)
}
 0x2af   :  { %s673_s9 = scalar_lea.hbm %s865_s11, 16 }
 0x2b0   :  { %p674_p5 = scmp.ne.s32.totalorder %s865_s11, %s673_s9  ;;  %p677_p6 = scmp.lt.u32.totalorder %s673_s9, %s865_s11 }
 0x2b2   :  { %p679_p7 = pnand %p677_p6, %p674_p5 }
 0x2b4   :  { %682 = shalt.err (!%p679_p7)
}
 0x2b5   :  { %540 = dma.vmem_to_hbm [thread:$0]  %s538_s21, 16, %s865_s11, [#allocation3]  }
 0x2b6   :  { %683 = dma.done.wait [#allocation3], 16  }
 0x2b7   :  { %684 = vsyncadd [#allocation3], 4294967280 }
 0x2b8   :  { %544 = vsyncpa [#allocation3], 1 }

</bundles_post_ra>
